<compile_context>
chip_gen: v6e
topology: v6e:2x2x1
jax: 0.10.0
libtpu: 0.0.40
codegen_flags: <defaults>
</compile_context>

<pallas_src>
import functools
import math

import jax
import jax.numpy as jnp
from jax import lax
from jax.experimental import pallas as pl
from jax.experimental.pallas import tpu as pltpu


def _round_up(n, m):
    return ((n + m - 1) // m) * m


def _fc_kernel(x_ref, w1_ref, b1_ref, w2_ref, b2_ref, o_ref, acc_ref,
               *, act_shift, act_clamp, batch_real):
    """Grid axis 0 tiles the fc1 reduction dim (K).  acc_ref holds the running
    fc1 result in f32; on the last K step we apply the activation, fc2 and a
    batch-masked log_softmax over dim=0."""
    k = pl.program_id(0)

    @pl.when(k == 0)
    def _init():
        # Fold the fc1 bias into the accumulator init (saves a VPU add later).
        acc_ref[...] = jnp.broadcast_to(b1_ref[...], acc_ref.shape)

    # fc1 partial product for this K tile (bf16/f32 operands, f32 accumulate).
    acc_ref[...] += jnp.dot(x_ref[...], w1_ref[...],
                            preferred_element_type=jnp.float32)

    @pl.when(k == pl.num_programs(0) - 1)
    def _finalize():
        # Activation: tanh, privacy shift, symmetric clamp (all in f32).
        h = jnp.tanh(acc_ref[...]) + act_shift
        h = jnp.clip(h, -act_clamp, act_clamp)

        # dfa1 / dfa are identity in the forward pass (feedback bookkeeping only).
        # TODO(synk): DFA feedback recording (backward-path random projection)
        # has no forward-pass compute and is not represented here.

        # fc2: (B_pad, H_pad) @ (H_pad, O_pad) + (1, O_pad)
        y = jnp.dot(h, w2_ref[...],
                    preferred_element_type=jnp.float32) + b2_ref[...]

        # log_softmax over dim=0 (batch), matching F.log_softmax(x, dim=0).
        # Zero-padded batch rows must not contribute to the per-column max/sum.
        row = lax.broadcasted_iota(jnp.int32, y.shape, 0)
        y = jnp.where(row < batch_real, y, -jnp.inf)
        m = jnp.max(y, axis=0, keepdims=True)
        z = y - m
        lse = jnp.log(jnp.sum(jnp.exp(z), axis=0, keepdims=True))
        o_ref[...] = z - lse
        # TODO(synk): a v7x megacore split over batch would require a two-pass
        # dim=0 log_softmax (cross-tile max then sum-exp); not needed at B<=8.


def fully_connected_forward(x_nchw, w1_t, b1, w2_t, b2,
                            tau_privacy=(1e-6, 0.1),
                            fc1_dtype=jnp.bfloat16,
                            tile_k=512):
    """x_nchw: (B, C, H, W) float32.  w1_t: (D, hidden), w2_t: (hidden, out).

    fc1_dtype: dtype of the fc1 matmul operands (bf16 recommended on v6e/v7x;
    accumulation is always f32).  tile_k: fc1 reduction-axis tile (multiple of 128).
    """
    B = x_nchw.shape[0]
    x2d = x_nchw.reshape(B, -1).astype(jnp.float32)          # (B, D)
    D = x2d.shape[1]
    hidden = w1_t.shape[1]
    out_num = w2_t.shape[1]

    # Host-side python scalars (no device round-trip).
    act_shift = float(tau_privacy[0]) / math.sqrt(float(hidden))
    act_clamp = float(tau_privacy[1]) / math.sqrt(float(hidden))

    # --- pad to TPU-friendly shapes (zeros do not change the math; padded
    #     batch rows are masked out of the dim=0 softmax inside the kernel) ---
    B_pad = _round_up(max(B, 8), 8)            # f32 sublane count
    H_pad = _round_up(max(hidden, 128), 128)   # full MXU columns for fc1/fc2
    O_pad = _round_up(max(out_num, 128), 128)  # lane-dense output store
    tile_k = _round_up(tile_k, 128)
    tile_k = min(tile_k, _round_up(D, 128))
    D_pad = _round_up(D, tile_k)
    num_k = D_pad // tile_k

    x_p = jnp.zeros((B_pad, D_pad), jnp.float32).at[:B, :D].set(x2d)
    x_p = x_p.astype(fc1_dtype)
    w1_p = jnp.zeros((D_pad, H_pad), jnp.float32).at[:D, :hidden].set(w1_t)
    w1_p = w1_p.astype(fc1_dtype)
    b1_p = jnp.zeros((1, H_pad), jnp.float32).at[0, :hidden].set(b1)
    w2_p = jnp.zeros((H_pad, O_pad), jnp.float32).at[:hidden, :out_num].set(w2_t)
    b2_p = jnp.zeros((1, O_pad), jnp.float32).at[0, :out_num].set(b2)

    kernel = functools.partial(_fc_kernel, act_shift=act_shift,
                               act_clamp=act_clamp, batch_real=B)

    itemsize = jnp.dtype(fc1_dtype).itemsize
    cost = pl.CostEstimate(
        flops=2 * B_pad * (D_pad * H_pad + H_pad * O_pad),
        transcendentals=B_pad * (H_pad + O_pad),
        bytes_accessed=(B_pad * D_pad * itemsize + D_pad * H_pad * itemsize
                        + H_pad * O_pad * 4 + H_pad * 4 + O_pad * 4
                        + B_pad * O_pad * 4))

    out_p = pl.pallas_call(
        kernel,
        out_shape=jax.ShapeDtypeStruct((B_pad, O_pad), jnp.float32),
        grid_spec=pltpu.PrefetchScalarGridSpec(
            num_scalar_prefetch=0,
            grid=(num_k,),
            in_specs=[
                pl.BlockSpec((B_pad, tile_k), lambda k: (0, k)),   # x tile
                pl.BlockSpec((tile_k, H_pad), lambda k: (k, 0)),   # W1 tile
                pl.BlockSpec((1, H_pad), lambda k: (0, 0)),        # b1 (resident)
                pl.BlockSpec((H_pad, O_pad), lambda k: (0, 0)),    # W2 (resident)
                pl.BlockSpec((1, O_pad), lambda k: (0, 0)),        # b2 (resident)
            ],
            out_specs=pl.BlockSpec((B_pad, O_pad), lambda k: (0, 0)),
            scratch_shapes=[pltpu.VMEM((B_pad, H_pad), jnp.float32)],
        ),
        compiler_params=pltpu.CompilerParams(
            dimension_semantics=("arbitrary",)),   # K is a reduction axis
        cost_estimate=cost,
    )(x_p, w1_p, b1_p, w2_p, b2_p)

    # Slice away the batch / output-lane padding.
    return out_p[:B, :out_num]


def _reference_forward(x_nchw, w1_t, b1, w2_t, b2, tau_privacy=(1e-6, 0.1)):
    """Pure-JAX f32 reference mirroring the PyTorch module."""
    B = x_nchw.shape[0]
    hidden = w1_t.shape[1]
    x = x_nchw.reshape(B, -1)
    h = jnp.dot(x, w1_t, precision=lax.Precision.HIGHEST) + b1
    shift = tau_privacy[0] / math.sqrt(float(hidden))
    clamp = tau_privacy[1] / math.sqrt(float(hidden))
    h = jnp.clip(jnp.tanh(h) + shift, -clamp, clamp)
    y = jnp.dot(h, w2_t, precision=lax.Precision.HIGHEST) + b2
    return jax.nn.log_softmax(y, axis=0)


if __name__ == "__main__":
    # Small shapes consistent with the module: NCHW image input, flattened.
    B, C, H, W = 2, 4, 16, 16
    input_num = C * H * W        # 1024
    hidden_size = 32
    output_num = 8

    key = jax.random.PRNGKey(0)
    kx, kw1, kb1, kw2, kb2 = jax.random.split(key, 5)

    x = jax.random.normal(kx, (B, C, H, W), dtype=jnp.float32)

    # Deterministic parameter init (PyTorch Linear-style uniform bounds).
    bound1 = 1.0 / math.sqrt(float(input_num))
    bound2 = 1.0 / math.sqrt(float(hidden_size))
    w1_t = jax.random.uniform(kw1, (input_num, hidden_size),
                              minval=-bound1, maxval=bound1, dtype=jnp.float32)
    b1 = jax.random.uniform(kb1, (hidden_size,),
                            minval=-bound1, maxval=bound1, dtype=jnp.float32)
    w2_t = jax.random.uniform(kw2, (hidden_size, output_num),
                              minval=-bound2, maxval=bound2, dtype=jnp.float32)
    b2 = jax.random.uniform(kb2, (output_num,),
                            minval=-bound2, maxval=bound2, dtype=jnp.float32)

    ref = _reference_forward(x, w1_t, b1, w2_t, b2)

    # 1) Exact-semantics check: f32 MXU operands.
    out_f32 = jax.block_until_ready(
        fully_connected_forward(x, w1_t, b1, w2_t, b2, fc1_dtype=jnp.float32))
    assert out_f32.shape == (B, output_num)
    assert jnp.allclose(out_f32, ref, atol=1e-4, rtol=1e-4)

    # 2) Performance path: bf16 fc1 operands (f32 accumulation) -> looser tol.
    out_bf16 = jax.block_until_ready(
        fully_connected_forward(x, w1_t, b1, w2_t, b2, fc1_dtype=jnp.bfloat16))
    assert out_bf16.shape == (B, output_num)
    assert jnp.allclose(out_bf16, ref, atol=3e-2, rtol=3e-2)

    print("KERNEL_OK")
</pallas_src>

<mosaic_0001>
module attributes {stable_mosaic.version = 11 : i64} {
  func.func @_fc_kernel(%arg0: i32, %arg1: memref<8x512xf32, #tpu.memory_space<vmem>>, %arg2: memref<512x128xf32, #tpu.memory_space<vmem>>, %arg3: memref<1x128xf32, #tpu.memory_space<vmem>>, %arg4: memref<128x128xf32, #tpu.memory_space<vmem>>, %arg5: memref<1x128xf32, #tpu.memory_space<vmem>>, %arg6: memref<8x128xf32, #tpu.memory_space<vmem>>, %arg7: memref<8x128xf32, #tpu.memory_space<vmem>>) attributes {dimension_semantics = [#tpu.dimension_semantics<arbitrary>], iteration_bounds = array<i64: 2>, scalar_prefetch = 0 : i64, scratch_operands = 1 : i64, tpu.core_type = #tpu.core_type<tc>, window_params = [{transform_indices = @transform_0, window_bounds = array<i64: 8, 512>}, {transform_indices = @transform_1, window_bounds = array<i64: 512, 128>}, {pipeline_mode = #tpu.pipeline_mode<synchronous>, transform_indices = @transform_2, window_bounds = array<i64: 1, 128>}, {pipeline_mode = #tpu.pipeline_mode<synchronous>, transform_indices = @transform_3, window_bounds = array<i64: 128, 128>}, {pipeline_mode = #tpu.pipeline_mode<synchronous>, transform_indices = @transform_4, window_bounds = array<i64: 1, 128>}, {pipeline_mode = #tpu.pipeline_mode<synchronous>, transform_indices = @transform_5, window_bounds = array<i64: 8, 128>}]} {
    %c0_i32 = arith.constant 0 : i32
    %0 = arith.cmpi eq, %arg0, %c0_i32 : i32
    %1 = arith.extui %0 : i1 to i32
    %c0_i32_0 = arith.constant 0 : i32
    %2 = arith.cmpi ne, %1, %c0_i32_0 : i32
    scf.if %2 {
      %c0_9 = arith.constant 0 : index
      %c0_10 = arith.constant 0 : index
      %12 = vector.load %arg3[%c0_9, %c0_10] : memref<1x128xf32, #tpu.memory_space<vmem>>, vector<1x128xf32>
      %13 = vector.shape_cast %12 : vector<1x128xf32> to vector<1x128xf32>
      %14 = vector.broadcast %13 : vector<1x128xf32> to vector<8x128xf32>
      %c0_11 = arith.constant 0 : index
      %c0_12 = arith.constant 0 : index
      %15 = vector.load %arg7[%c0_11, %c0_12] : memref<8x128xf32, #tpu.memory_space<vmem>>, vector<8x128xf32>
      tpu.vector_store %arg7[%c0_11, %c0_12], %14 {strides = array<i32>} : memref<8x128xf32, #tpu.memory_space<vmem>>, vector<8x128xf32>,
    } else {
    }
    %c0 = arith.constant 0 : index
    %c0_1 = arith.constant 0 : index
    %3 = vector.load %arg7[%c0, %c0_1] : memref<8x128xf32, #tpu.memory_space<vmem>>, vector<8x128xf32>
    %c0_2 = arith.constant 0 : index
    %c0_3 = arith.constant 0 : index
    %4 = vector.load %arg1[%c0_2, %c0_3] : memref<8x512xf32, #tpu.memory_space<vmem>>, vector<8x512xf32>
    %c0_4 = arith.constant 0 : index
    %c0_5 = arith.constant 0 : index
    %5 = vector.load %arg2[%c0_4, %c0_5] : memref<512x128xf32, #tpu.memory_space<vmem>>, vector<512x128xf32>
    %cst = arith.constant dense<0.000000e+00> : vector<8x128xf32>
    %6 = tpu.matmul %4, %5, %cst {dimension_numbers = #tpu.dot_dimension_numbers<[1], [0], [0], [1], [0, 0, 1, 1], [], []>} : vector<8x512xf32>, vector<512x128xf32>, vector<8x128xf32> -> vector<8x128xf32>
    %7 = arith.addf %3, %6 : vector<8x128xf32>
    %c0_6 = arith.constant 0 : index
    %c0_7 = arith.constant 0 : index
    %8 = vector.load %arg7[%c0_6, %c0_7] : memref<8x128xf32, #tpu.memory_space<vmem>>, vector<8x128xf32>
    tpu.vector_store %arg7[%c0_6, %c0_7], %7 {strides = array<i32>} : memref<8x128xf32, #tpu.memory_space<vmem>>, vector<8x128xf32>,
    %c1_i32 = arith.constant 1 : i32
    %9 = arith.cmpi eq, %arg0, %c1_i32 : i32
    %10 = arith.extui %9 : i1 to i32
    %c0_i32_8 = arith.constant 0 : i32
    %11 = arith.cmpi ne, %10, %c0_i32_8 : i32
    scf.if %11 {
      %c0_9 = arith.constant 0 : index
      %c0_10 = arith.constant 0 : index
      %12 = vector.load %arg7[%c0_9, %c0_10] : memref<8x128xf32, #tpu.memory_space<vmem>>, vector<8x128xf32>
      %13 = math.tanh %12 : vector<8x128xf32>
      %cst_11 = arith.constant 1.76776695E-7 : f32
      %14 = vector.broadcast %cst_11 : f32 to vector<8x128xf32>
      %15 = arith.addf %13, %14 : vector<8x128xf32>
      %cst_12 = arith.constant -0.0176776703 : f32
      %cst_13 = arith.constant 0.0176776703 : f32
      %16 = vector.broadcast %cst_12 : f32 to vector<8x128xf32>
      %17 = arith.maximumf %16, %15 : vector<8x128xf32>
      %18 = vector.broadcast %cst_13 : f32 to vector<8x128xf32>
      %19 = arith.minimumf %18, %17 : vector<8x128xf32>
      %c0_14 = arith.constant 0 : index
      %c0_15 = arith.constant 0 : index
      %20 = vector.load %arg4[%c0_14, %c0_15] : memref<128x128xf32, #tpu.memory_space<vmem>>, vector<128x128xf32>
      %cst_16 = arith.constant dense<0.000000e+00> : vector<8x128xf32>
      %21 = tpu.matmul %19, %20, %cst_16 {dimension_numbers = #tpu.dot_dimension_numbers<[1], [0], [0], [1], [0, 0, 1, 1], [], []>} : vector<8x128xf32>, vector<128x128xf32>, vector<8x128xf32> -> vector<8x128xf32>
      %c0_17 = arith.constant 0 : index
      %c0_18 = arith.constant 0 : index
      %22 = vector.load %arg5[%c0_17, %c0_18] : memref<1x128xf32, #tpu.memory_space<vmem>>, vector<1x128xf32>
      %23 = vector.broadcast %22 : vector<1x128xf32> to vector<8x128xf32>
      %24 = arith.addf %21, %23 : vector<8x128xf32>
      %25 = tpu.iota {dimensions = array<i32: 0>} : vector<8x128xi32>
      %c2_i32 = arith.constant 2 : i32
      %26 = vector.broadcast %c2_i32 : i32 to vector<8x128xi32>
      %27 = arith.cmpi slt, %25, %26 : vector<8x128xi32>
      %cst_19 = arith.constant 0xFF800000 : f32
      %28 = vector.broadcast %cst_19 : f32 to vector<8x128xf32>
      %29 = arith.select %27, %24, %28 : vector<8x128xi1>, vector<8x128xf32>
      %cst_20 = arith.constant dense<0xFF800000> : vector<128xf32>
      %30 = vector.multi_reduction <maximumf>, %29, %cst_20 [0] : vector<8x128xf32> to vector<128xf32>
      %31 = vector.shape_cast %30 : vector<128xf32> to vector<1x128xf32>
      %32 = vector.broadcast %31 : vector<1x128xf32> to vector<8x128xf32>
      %33 = arith.subf %29, %32 : vector<8x128xf32>
      %34 = math.exp %33 : vector<8x128xf32>
      %cst_21 = arith.constant dense<0.000000e+00> : vector<128xf32>
      %35 = vector.multi_reduction <add>, %34, %cst_21 [0] : vector<8x128xf32> to vector<128xf32>
      %36 = vector.shape_cast %35 : vector<128xf32> to vector<1x128xf32>
      %37 = math.log %36 : vector<1x128xf32>
      %38 = vector.broadcast %37 : vector<1x128xf32> to vector<8x128xf32>
      %39 = arith.subf %33, %38 : vector<8x128xf32>
      %c0_22 = arith.constant 0 : index
      %c0_23 = arith.constant 0 : index
      %40 = vector.load %arg6[%c0_22, %c0_23] : memref<8x128xf32, #tpu.memory_space<vmem>>, vector<8x128xf32>
      tpu.vector_store %arg6[%c0_22, %c0_23], %39 {strides = array<i32>} : memref<8x128xf32, #tpu.memory_space<vmem>>, vector<8x128xf32>,
    } else {
    }
    return
  }
  func.func @transform_0(%arg0: i32) -> (i32, i32) {
    %c0_i32 = arith.constant 0 : i32
    %c0_i32_0 = arith.constant 0 : i32
    return %c0_i32, %arg0 : i32, i32
  }
  func.func @transform_1(%arg0: i32) -> (i32, i32) {
    %c0_i32 = arith.constant 0 : i32
    %c0_i32_0 = arith.constant 0 : i32
    return %arg0, %c0_i32 : i32, i32
  }
  func.func @transform_2(%arg0: i32) -> (i32, i32) {
    %c0_i32 = arith.constant 0 : i32
    %c0_i32_0 = arith.constant 0 : i32
    %c0_i32_1 = arith.constant 0 : i32
    return %c0_i32, %c0_i32_0 : i32, i32
  }
  func.func @transform_3(%arg0: i32) -> (i32, i32) {
    %c0_i32 = arith.constant 0 : i32
    %c0_i32_0 = arith.constant 0 : i32
    %c0_i32_1 = arith.constant 0 : i32
    return %c0_i32, %c0_i32_0 : i32, i32
  }
  func.func @transform_4(%arg0: i32) -> (i32, i32) {
    %c0_i32 = arith.constant 0 : i32
    %c0_i32_0 = arith.constant 0 : i32
    %c0_i32_1 = arith.constant 0 : i32
    return %c0_i32, %c0_i32_0 : i32, i32
  }
  func.func @transform_5(%arg0: i32) -> (i32, i32) {
    %c0_i32 = arith.constant 0 : i32
    %c0_i32_0 = arith.constant 0 : i32
    %c0_i32_1 = arith.constant 0 : i32
    return %c0_i32, %c0_i32_0 : i32, i32
  }
}

</mosaic_0001>

<bundles_post_ra>
// kernel: tpu_custom_call.1
= control target key start
LH: loop header
LB: loop body
LE: loop exit
PB: predicated region body
PF: predicated region fallthrough
CT: control target
= control target key end

     0   :  { %10 = vsyncpa [#allocation4], 0  ;;  %s1402_s0 = inlined_call_operand.hbm [shape: f32[8,1024], index: 0, kind: input, shape index: {}]   ;;  %s1403_s1 = inlined_call_operand.hbm [shape: f32[1024,128], index: 1, kind: input, shape index: {}]   ;;  %s1404_s2 = inlined_call_operand.vmem [shape: f32[1,128], index: 2, kind: input, shape index: {}]   ;;  %s1405_s3 = inlined_call_operand.hbm [shape: f32[128,128], index: 3, kind: input, shape index: {}]   ;;  %s1406_s4 = inlined_call_operand.vmem [shape: f32[1,128], index: 4, kind: input, shape index: {}]   ;;  %s1407_s5 = inlined_call_operand.hbm [shape: f32[8,128], index: 5, kind: output, shape index: {}]  }
   0x1   :  { %12 = vsyncpa [#allocation4 + $0x1], 0 }
   0x2   :  { %13 = vsyncpa [#allocation7], 0 }
   0x3   :  { %15 = vsyncpa [#allocation7 + $0x1], 0 }
   0x4   :  { %16 = vsyncpa [#allocation5], 0  ;;  %s1133_s18 = smov 0   ;;  %s1135_s19 = smov 0  }
   0x5   :  { %s1137_s20 = smov 0   ;;  %s1139_s21 = smov 0  }
   0x6 LB: > { %s1152_s22 = sadd.s32 4294967295, %s1093_s21   ;;  %p42_p0 = scmp.ne.s32.totalorder %s1085_s19, %s1081_s18  ;;  %s1093_s21 = sphi %s1139_s21, %s1421_s21   ;;  %s1089_s20 = sphi %s1137_s20, %s1420_s20   ;;  %s1085_s19 = sphi %s1135_s19, %s1419_s19   ;;  %s1081_s18 = sphi %s1133_s18, %s1418_s18  }
   0x7   : > { %p1408_p1 = scmp.eq.s32.totalorder %s1152_s22, 0  ;;  %p723_p2 = scmp.ge.s32.totalorder %s1093_s21, 1 }
   0x8   : > { %p163_p3 = scmp.lt.s32.totalorder %s1093_s21, 3  ;;  %s1095_s25 = smov [#allocation8]  }
   0x9   : > { %p1161_p5 = por %p1408_p1, %p42_p0  ;;  %s178_s26 = sshll.u32 %s1095_s25, 4  ;;  %s179_s26 = int_to_ptr.vmem [resolvable:$true] %s178_s26 }
   0xa   : > { %p1165_p6 = pnand %p723_p2, %p163_p3  ;;  %s1178_s28 = sadd.s32 1, %s1093_s21  }
   0xb   : > { %s1410_s23 = scalar_select %p1161_p5, 1, 0 }
   0xc   : > { %p881_p7 = pneg %p1165_p6  ;;  %s29_s29 = sadd.s32 1, %s1089_s20 }
   0xd   : > { %s26_s30 = ssub.s32 %s1093_s21, %s1178_s28  ;;  %s952_s6 = scalar_lea.vmem %s179_s26, 2048 }
   0xe   : > { %p1173_p8 = pnand %p881_p7, %p1408_p1  ;;  %p953_p10 = scmp.ne.s32.totalorder %s179_s26, %s952_s6 }
   0xf   : > { %p960_p13 = scmp.lt.s32.totalorder %s179_s26, %s179_s26  ;;  %p961_p0 = scmp.lt.s32.totalorder %s952_s6, %s952_s6 }
  0x10   : > { %p943_p9 = pneg %p1173_p8 }
  0x11   : > { %p962_p2 = por %p961_p0, %p960_p13 }
  0x12   : > { %p955_p11 = pnand %p953_p10, %p943_p9 }
  0x14   : > { %p956_p12 = pneg %p955_p11 }
  0x16   : > { %p963_p3 = pnand %p962_p2, %p956_p12 }
  0x18   : > { %966 = shalt.err (!%p963_p3)
}
  0x19   : > { %s1096_s7 = smov 128   ;;  %s1097_s8 = smov 8  }
  0x1a   : > { %884 = dma.hbm_to_vmem [thread:$0]  (!%p1173_p8), %s1405_s3, 2048, %s179_s26, [#allocation7], %s1096_s7, %s1096_s7, %s1097_s8  }
  0x1b   : > { %p27_p7 = scmp.eq.s32.totalorder %s26_s30, 0  ;;  %p36_p9 = scmp.ne.s32.totalorder %s1089_s20, %s1085_s19 }
  0x1c   : > { %p37_p10 = scmp.eq.s32.totalorder %s1093_s21, 0  ;;  %p893_p11 = scmp.lt.s32.totalorder %s1093_s21, 2 }
  0x1d   : > { %s1198_s11 = scalar_select %p27_p7, %s1089_s20, %s29_s29  }
  0x1e   : > { %p38_p12 = por %p37_p10, %p36_p9  ;;  %s1201_s12 = sand.u32 1, %s1089_s20  }
  0x1f   : > { %s726_s13 = sshll.u32 %s1201_s12, 5  ;;  %s745_s14 = sshll.u32 %s1093_s21, 9 }
  0x20   : > { %s1208_s17 = scalar_lea.hbm %s1402_s0, %s745_s14  ;;  %s199_s18 = scalar_lea.vmem [#allocation3], %s726_s13 }
  0x21   : > { %s207_s25 = sshll.u32 %s199_s18, 4  ;;  %p1212_p8 = pnand %p893_p11, %p38_p12  ;;  %s1210_s25 = int_to_ptr.vmem [resolvable:$true] %s207_s25 }
  0x22   : > { %s729_s27 = sshll.u32 %s1201_s12, 9  ;;  %s214_s29 = sand.u32 1, %s1093_s21  }
  0x23   : > { %s196_s30 = scalar_lea.sflag [#allocation4], %s1201_s12  ;;  %s967_s6 = scalar_lea.hbm %s1208_s17, 512 }
  0x24   : > { %p968_p13 = scmp.ne.s32.totalorder %s1208_s17, %s967_s6  ;;  %p969_p0 = pneg %p1212_p8 }
  0x25   : > { %s972_s13 = scalar_lea.hbm %s1402_s0, 1024  ;;  %p973_p7 = scmp.lt.s32.totalorder %s1208_s17, %s1402_s0 }
  0x26   : > { %p970_p2 = pnand %p969_p0, %p968_p13  ;;  %p974_p9 = scmp.lt.s32.totalorder %s972_s13, %s967_s6 }
  0x28   : > { %p971_p3 = pneg %p970_p2  ;;  %p975_p10 = por %p974_p9, %p973_p7 }
  0x2a   : > { %p976_p11 = pnand %p975_p10, %p971_p3 }
  0x2c   : > { %979 = shalt.err (!%p976_p11)
}
  0x2d   : > { %s980_s16 = scalar_lea.vmem %s1210_s25, 512  ;;  %s1098_s18 = smov [#allocation3]  }
  0x2e   : > { %p981_p12 = scmp.ne.s32.totalorder %s1210_s25, %s980_s16  ;;  %s985_s9 = sshll.u32 %s1098_s18, 4  ;;  %s986_s9 = int_to_ptr.vmem [resolvable:$false] %s985_s9 }
  0x2f   : > { %s987_s10 = scalar_lea.vmem %s986_s9, 1024  ;;  %p988_p4 = scmp.lt.s32.totalorder %s1210_s25, %s986_s9 }
  0x30   : > { %p983_p13 = pnand %p981_p12, %p969_p0  ;;  %p989_p1 = scmp.lt.s32.totalorder %s987_s10, %s980_s16 }
  0x32   : > { %p984_p2 = pneg %p983_p13  ;;  %p990_p5 = por %p989_p1, %p988_p4 }
  0x34   : > { %p991_p7 = pnand %p990_p5, %p984_p2 }
  0x36   : > { %994 = shalt.err (!%p991_p7)
}
  0x37   : > { %888 = dma.hbm_to_vmem [thread:$0]  (!%p1212_p8), %s1208_s17, 512, %s1210_s25, %s196_s30  }
  0x38   : > { %s218_s6 = scalar_lea.vmem [#allocation6], %s729_s27  ;;  %s746_s14 = sshll.u32 %s1093_s21, 13 }
  0x39   : > { %s225_s13 = sshll.u32 %s218_s6, 4  ;;  %s1251_s18 = scalar_lea.hbm %s1403_s1, %s746_s14  ;;  %s1245_s13 = int_to_ptr.vmem [resolvable:$true] %s225_s13 }
  0x3a   : > { %s215_s9 = scalar_lea.sflag [#allocation7], %s214_s29  ;;  %s995_s10 = scalar_lea.hbm %s1251_s18, 8192 }
  0x3b   : > { %p996_p1 = scmp.ne.s32.totalorder %s1251_s18, %s995_s10  ;;  %s1000_s25 = scalar_lea.hbm %s1403_s1, 16384 }
  0x3c   : > { %p1001_p3 = scmp.lt.s32.totalorder %s1251_s18, %s1403_s1  ;;  %p1002_p9 = scmp.lt.s32.totalorder %s1000_s25, %s995_s10 }
  0x3d   : > { %p998_p4 = pnand %p996_p1, %p969_p0 }
  0x3e   : > { %p1003_p10 = por %p1002_p9, %p1001_p3 }
  0x3f   : > { %p999_p5 = pneg %p998_p4 }
  0x41   : > { %p1004_p11 = pnand %p1003_p10, %p999_p5 }
  0x43   : > { %1007 = shalt.err (!%p1004_p11)
}
  0x44   : > { %s1008_s21 = scalar_lea.vmem %s1245_s13, 8192  ;;  %s1099_s29 = smov [#allocation6]  }
  0x45   : > { %p1009_p12 = scmp.ne.s32.totalorder %s1245_s13, %s1008_s21  ;;  %s1013_s6 = sshll.u32 %s1099_s29, 4  ;;  %s1014_s6 = int_to_ptr.vmem [resolvable:$false] %s1013_s6 }
  0x46   : > { %s1015_s14 = scalar_lea.vmem %s1014_s6, 16384  ;;  %p1016_p7 = scmp.lt.s32.totalorder %s1245_s13, %s1014_s6 }
  0x47   : > { %p1011_p13 = pnand %p1009_p12, %p969_p0  ;;  %p1017_p1 = scmp.lt.s32.totalorder %s1015_s14, %s1008_s21 }
  0x49   : > { %p1012_p2 = pneg %p1011_p13  ;;  %p1018_p4 = por %p1017_p1, %p1016_p7 }
  0x4b   : > { %p1019_p3 = pnand %p1018_p4, %p1012_p2 }
  0x4d   : > { %1022 = shalt.err (!%p1019_p3)
}
  0x4e   : > { %891 = dma.hbm_to_vmem [thread:$0]  (!%p1212_p8), %s1251_s18, 8192, %s1245_s13, %s215_s9, %s1096_s7, %s1096_s7, %s1097_s8  }
  0x4f   : > { %237 = sbr.rel (%p1165_p6) target bundleno = 643 (0x283), region = 40  ;;  %s239_s15 = sand.u32 (!%p1165_p6), 1, %s1085_s19  }
  0x50   : > { %s733_s16 = sshll.u32 (!%p1165_p6), %s239_s15, 5  ;;  %s240_s10 = scalar_lea.sflag (!%p1165_p6), [#allocation4], %s239_s15 }
  0x51   : > { %s1283_s12 = scalar_lea.vmem (!%p1165_p6), [#allocation3], %s733_s16  ;;  %p1414_p0 = scmp.ne.s32.totalorder (!%p1165_p6), %s1410_s23, 0 }
  0x54   : > { %1064 = dma.done.wait (%p1414_p0), %s240_s10, 512  }
  0x55   : > { %1066 = vsyncadd (%p1414_p0), %s240_s10, 4294966784  ;;  %s248_s26 = sand.u32 1, %s1152_s22   ;;  %s734_s17 = sshll.u32 %s239_s15, 9 }
  0x56   : > { %s249_s7 = scalar_lea.sflag [#allocation7], %s248_s26  ;;  %s1290_s8 = scalar_lea.vmem [#allocation6], %s734_s17 }
  0x57   : > { %1068 = dma.done.wait (%p1414_p0), %s249_s7, 8192  }
  0x58   : > { %1070 = vsyncadd (%p1414_p0), %s249_s7, 4294959104  ;;  %p1415_p6 = scmp.eq.s32.totalorder %s1152_s22, 0 }
  0x5a   : > { %1072 = dma.done.wait (%p1415_p6), [#allocation7], 2048   ;;  %p1416_p8 = pmov %p1415_p6 }
  0x5b   : > { %p1417_p5 = scmp.ne.s32.totalorder %s1152_s22, 0 }
  0x5c   : > { %1074 = vsyncadd (%p1416_p8), [#allocation7], 4294965248 }
  0x5d   : > { %288 = sbr.rel (%p1417_p5) target bundleno = 100 (0x64), region = 56 }
  0x62   : > { %v737_v0 = vld [vmem:[%s1404_s2] ss:$0 sm:$0xff] }
  0x63   : > { %296 = vst [vmem:[#allocation2] sm:$0xff] %v737_v0 }
  0x64 PF: > { %v333_v1 = vld [vmem:[%s1290_s8 + $0xf8] sm:$0xff]  ;;  %v332_v5 = vld [vmem:[%s1290_s8 + $0xf0] sm:$0xff]  ;;  %v331_v9 = vld [vmem:[%s1290_s8 + $0xe8] sm:$0xff]  ;;  %p738_p9 = scmp.ne.s32.totalorder %s1152_s22, 1 }
  0x65   : > { %v365_v2 = vld [vmem:[%s1290_s8 + $0x1f8] sm:$0xff]  ;;  %747 = vmatprep.subr.mxu0 %v333_v1  ;;  %v364_v6 = vld [vmem:[%s1290_s8 + $0x1f0] sm:$0xff]  ;;  %v363_v10 = vld [vmem:[%s1290_s8 + $0x1e8] sm:$0xff] }
  0x66   : > { %v317_v3 = vld [vmem:[%s1290_s8 + $0x78] sm:$0xff]  ;;  %782 = vmatprep.subr.mxu1 %v365_v2  ;;  %v316_v7 = vld [vmem:[%s1290_s8 + $0x70] sm:$0xff]  ;;  %v315_v11 = vld [vmem:[%s1290_s8 + $0x68] sm:$0xff] }
  0x67   : > { %v349_v4 = vld [vmem:[%s1290_s8 + $0x178] sm:$0xff]  ;;  %748 = vmatpush3.msra.mxu0 %v317_v3  ;;  %v348_v8 = vld [vmem:[%s1290_s8 + $0x170] sm:$0xff]  ;;  %v347_v12 = vld [vmem:[%s1290_s8 + $0x168] sm:$0xff] }
  0x68   : > { %783 = vmatpush3.msra.mxu1 %v349_v4  ;;  %749 = vmatprep.subr.mxu0 %v332_v5  ;;  %v330_v13 = vld [vmem:[%s1290_s8 + $0xe0] sm:$0xff]  ;;  %v329_v17 = vld [vmem:[%s1290_s8 + $0xd8] sm:$0xff]  ;;  %v328_v21 = vld [vmem:[%s1290_s8 + $0xd0] sm:$0xff] }
  0x69   : > { %784 = vmatprep.subr.mxu1 %v364_v6  ;;  %750 = vmatpush3.msra.mxu0 %v316_v7  ;;  %v362_v14 = vld [vmem:[%s1290_s8 + $0x1e0] sm:$0xff]  ;;  %v361_v18 = vld [vmem:[%s1290_s8 + $0x1d8] sm:$0xff]  ;;  %v360_v22 = vld [vmem:[%s1290_s8 + $0x1d0] sm:$0xff] }
  0x6a   : > { %785 = vmatpush3.msra.mxu1 %v348_v8  ;;  %751 = vmatprep.subr.mxu0 %v331_v9  ;;  %v314_v15 = vld [vmem:[%s1290_s8 + $0x60] sm:$0xff]  ;;  %v313_v19 = vld [vmem:[%s1290_s8 + $0x58] sm:$0xff]  ;;  %v312_v23 = vld [vmem:[%s1290_s8 + $0x50] sm:$0xff] }
  0x6b   : > { %786 = vmatprep.subr.mxu1 %v363_v10  ;;  %v346_v16 = vld [vmem:[%s1290_s8 + $0x160] sm:$0xff]  ;;  %752 = vmatpush3.msra.mxu0 %v315_v11  ;;  %v345_v20 = vld [vmem:[%s1290_s8 + $0x158] sm:$0xff]  ;;  %v344_v24 = vld [vmem:[%s1290_s8 + $0x150] sm:$0xff] }
  0x6c   : > { %787 = vmatpush3.msra.mxu1 %v347_v12  ;;  %753 = vmatprep.subr.mxu0 %v330_v13  ;;  %v327_v25 = vld [vmem:[%s1290_s8 + $0xc8] sm:$0xff]  ;;  %v326_v29 = vld [vmem:[%s1290_s8 + $0xc0] sm:$0xff]  ;;  %v325_v33 = vld [vmem:[%s1290_s8 + $0xb8] sm:$0xff] }
  0x6d   : > { %788 = vmatprep.subr.mxu1 %v362_v14  ;;  %754 = vmatpush3.msra.mxu0 %v314_v15  ;;  %v359_v26 = vld [vmem:[%s1290_s8 + $0x1c8] sm:$0xff]  ;;  %v358_v30 = vld [vmem:[%s1290_s8 + $0x1c0] sm:$0xff]  ;;  %v357_v34 = vld [vmem:[%s1290_s8 + $0x1b8] sm:$0xff] }
  0x6e   : > { %789 = vmatpush3.msra.mxu1 %v346_v16  ;;  %755 = vmatprep.subr.mxu0 %v329_v17  ;;  %v311_v27 = vld [vmem:[%s1290_s8 + $0x48] sm:$0xff]  ;;  %v310_v31 = vld [vmem:[%s1290_s8 + $0x40] sm:$0xff]  ;;  %v309_v35 = vld [vmem:[%s1290_s8 + $0x38] sm:$0xff] }
  0x6f   : > { %790 = vmatprep.subr.mxu1 %v361_v18  ;;  %756 = vmatpush3.msra.mxu0 %v313_v19  ;;  %v343_v28 = vld [vmem:[%s1290_s8 + $0x148] sm:$0xff]  ;;  %v342_v32 = vld [vmem:[%s1290_s8 + $0x140] sm:$0xff]  ;;  %v341_v36 = vld [vmem:[%s1290_s8 + $0x138] sm:$0xff] }
  0x70   : > { %791 = vmatpush3.msra.mxu1 %v345_v20  ;;  %757 = vmatprep.subr.mxu0 %v328_v21  ;;  %v324_v37 = vld [vmem:[%s1290_s8 + $0xb0] sm:$0xff]  ;;  %v323_v41 = vld [vmem:[%s1290_s8 + $0xa8] sm:$0xff]  ;;  %v322_v45 = vld [vmem:[%s1290_s8 + $0xa0] sm:$0xff] }
  0x71   : > { %792 = vmatprep.subr.mxu1 %v360_v22  ;;  %758 = vmatpush3.msra.mxu0 %v312_v23  ;;  %v356_v38 = vld [vmem:[%s1290_s8 + $0x1b0] sm:$0xff]  ;;  %v355_v42 = vld [vmem:[%s1290_s8 + $0x1a8] sm:$0xff]  ;;  %v354_v46 = vld [vmem:[%s1290_s8 + $0x1a0] sm:$0xff] }
  0x72   : > { %793 = vmatpush3.msra.mxu1 %v344_v24  ;;  %759 = vmatprep.subr.mxu0 %v327_v25  ;;  %v308_v39 = vld [vmem:[%s1290_s8 + $0x30] sm:$0xff]  ;;  %v307_v43 = vld [vmem:[%s1290_s8 + $0x28] sm:$0xff]  ;;  %v306_v47 = vld [vmem:[%s1290_s8 + $0x20] sm:$0xff] }
  0x73   : > { %794 = vmatprep.subr.mxu1 %v359_v26  ;;  %760 = vmatpush3.msra.mxu0 %v311_v27  ;;  %v340_v40 = vld [vmem:[%s1290_s8 + $0x130] sm:$0xff]  ;;  %v339_v44 = vld [vmem:[%s1290_s8 + $0x128] sm:$0xff]  ;;  %v338_v48 = vld [vmem:[%s1290_s8 + $0x120] sm:$0xff] }
  0x74   : > { %795 = vmatpush3.msra.mxu1 %v343_v28  ;;  %761 = vmatprep.subr.mxu0 %v326_v29  ;;  %v321_v49 = vld [vmem:[%s1290_s8 + $0x98] sm:$0xff]  ;;  %v320_v53 = vld [vmem:[%s1290_s8 + $0x90] sm:$0xff]  ;;  %v319_v57 = vld [vmem:[%s1290_s8 + $0x88] sm:$0xff] }
  0x75   : > { %796 = vmatprep.subr.mxu1 %v358_v30  ;;  %762 = vmatpush3.msra.mxu0 %v310_v31  ;;  %v353_v50 = vld [vmem:[%s1290_s8 + $0x198] sm:$0xff]  ;;  %v352_v54 = vld [vmem:[%s1290_s8 + $0x190] sm:$0xff]  ;;  %v351_v58 = vld [vmem:[%s1290_s8 + $0x188] sm:$0xff] }
  0x76   : > { %797 = vmatpush3.msra.mxu1 %v342_v32  ;;  %763 = vmatprep.subr.mxu0 %v325_v33  ;;  %v305_v51 = vld [vmem:[%s1290_s8 + $0x18] sm:$0xff]  ;;  %v304_v55 = vld [vmem:[%s1290_s8 + $0x10] sm:$0xff]  ;;  %v303_v59 = vld [vmem:[%s1290_s8 + $0x8] sm:$0xff] }
  0x77   : > { %798 = vmatprep.subr.mxu1 %v357_v34  ;;  %764 = vmatpush3.msra.mxu0 %v309_v35  ;;  %v337_v52 = vld [vmem:[%s1290_s8 + $0x118] sm:$0xff]  ;;  %v336_v56 = vld [vmem:[%s1290_s8 + $0x110] sm:$0xff]  ;;  %v335_v60 = vld [vmem:[%s1290_s8 + $0x108] sm:$0xff] }
  0x78   : > { %799 = vmatpush3.msra.mxu1 %v341_v36  ;;  %765 = vmatprep.subr.mxu0 %v324_v37  ;;  %v318_v61 = vld [vmem:[%s1290_s8 + $0x80] sm:$0xff]  ;;  %v299_v0 = vld [vmem:[%s1283_s12 + $0x8] sm:$0xff]  ;;  %v301_v2 = vld [vmem:[%s1283_s12 + $0x18] sm:$0xff] }
  0x79   : > { %800 = vmatprep.subr.mxu1 %v356_v38  ;;  %766 = vmatpush3.msra.mxu0 %v308_v39  ;;  %v350_v62 = vld [vmem:[%s1290_s8 + $0x180] sm:$0xff]  ;;  %v300_v4 = vld [vmem:[%s1283_s12 + $0x10] sm:$0xff]  ;;  %v297_v11 = vld [vmem:[#allocation2] sm:$0xff] }
  0x7a   : > { %801 = vmatpush3.msra.mxu1 %v340_v40  ;;  %767 = vmatprep.subr.mxu0 %v323_v41  ;;  %v302_v63 = vld [vmem:[%s1290_s8] sm:$0xff] }
  0x7b   : > { %802 = vmatprep.subr.mxu1 %v355_v42  ;;  %768 = vmatpush3.msra.mxu0 %v307_v43  ;;  %v334_v1 = vld [vmem:[%s1290_s8 + $0x100] sm:$0xff] }
  0x7c   : > { %803 = vmatpush3.msra.mxu1 %v339_v44  ;;  %769 = vmatprep.subr.mxu0 %v322_v45  ;;  %v298_v3 = vld [vmem:[%s1283_s12] sm:$0xff] }
  0x7d   : > { %804 = vmatprep.subr.mxu1 %v354_v46  ;;  %770 = vmatpush3.msra.mxu0 %v306_v47 }
  0x7e   : > { %805 = vmatpush3.msra.mxu1 %v338_v48  ;;  %771 = vmatprep.subr.mxu0 %v321_v49 }
  0x7f   : > { %806 = vmatprep.subr.mxu1 %v353_v50  ;;  %772 = vmatpush3.msra.mxu0 %v305_v51 }
  0x80   : > { %807 = vmatpush3.msra.mxu1 %v337_v52  ;;  %773 = vmatprep.subr.mxu0 %v320_v53 }
  0x81   : > { %808 = vmatprep.subr.mxu1 %v352_v54  ;;  %774 = vmatpush3.msra.mxu0 %v304_v55 }
  0x82   : > { %809 = vmatpush3.msra.mxu1 %v336_v56  ;;  %775 = vmatprep.subr.mxu0 %v319_v57 }
  0x83   : > { %810 = vmatprep.subr.mxu1 %v351_v58  ;;  %776 = vmatpush3.msra.mxu0 %v303_v59 }
  0x84   : > { %811 = vmatpush3.msra.mxu1 %v335_v60  ;;  %777 = vmatprep.subr.mxu0 %v318_v61 }
  0x85   : > { %812 = vmatprep.subr.mxu1 %v350_v62  ;;  %778 = vmatpush3.msra.mxu0 %v302_v63 }
  0x86   : > { %430 = vmatprep.mubr.f32.mxu0 %v299_v0  ;;  %813 = vmatpush3.msra.mxu1 %v334_v1 }
  0x87   : > { %500 = vmatprep.mubr.f32.mxu1 %v301_v2  ;;  %431 = vmatmul.mubr.f32.vlgmr.msra.gmra.mxu0 %v298_v3 }
  0x88   : > { %501 = vmatmul.mubr.f32.vlgmr.msra.gmra.mxu1 %v300_v4 }
 0x147   : > { %v779_v5 = vpop.f32.mrf.mxu0 }
 0x148   : > { %v814_v6 = vpop.f32.mrf.mxu1 }
 0x149   : > { %v780_v7 = vpop.f32.mrf.mxu0 }
 0x14a   : > { %v815_v8 = vpop.f32.mrf.mxu1  ;;  %v781_v9 = vadd.f32 %v780_v7, %v779_v5 }
 0x14b   : > { %v816_v10 = vadd.f32 %v815_v8, %v814_v6 }
 0x14d   : > { %v503_v12 = vadd.f32 %v816_v10, %v781_v9  ;;  %511 = sbr.rel (%p738_p9) target bundleno = 628 (0x274), region = 60 }
 0x14f   : > { %v506_v13 = vadd.f32 %v503_v12, %v297_v11 }
 0x151   : > { %507 = vst [vmem:[#allocation2] sm:$0xff] %v506_v13 }
 0x152   : > { %v532_v14 = vld [vmem:[#allocation8 + $0x78] sm:$0xff]  ;;  %v1100_v15 = vmov 0.0   ;;  %v531_v16 = vld [vmem:[#allocation8 + $0x70] sm:$0xff]  ;;  %vm1101_vm0 = vmmov 0   ;;  %v530_v17 = vld [vmem:[#allocation8 + $0x68] sm:$0xff]  ;;  %v610_v35 = vlaneseq }
 0x153   : > { %834 = vmatprep.subr.mxu0 %v1100_v15  ;;  %866 = vmatprep.mubr.msk.f32.mxu0 %vm1101_vm0, %v1100_v15  ;;  %v529_v18 = vld [vmem:[#allocation8 + $0x60] sm:$0xff]  ;;  %v528_v20 = vld [vmem:[#allocation8 + $0x58] sm:$0xff]  ;;  %v527_v21 = vld [vmem:[#allocation8 + $0x50] sm:$0xff] }
 0x154   : > { %835 = vmatpush3.msra.mxu0 %v532_v14  ;;  %v526_v22 = vld [vmem:[#allocation8 + $0x48] sm:$0xff]  ;;  %v525_v23 = vld [vmem:[#allocation8 + $0x40] sm:$0xff]  ;;  %v524_v24 = vld [vmem:[#allocation8 + $0x38] sm:$0xff]  ;;  %v611_v36 = vshrl.u32 %v610_v35, 7 }
 0x155   : > { %836 = vmatprep.subr.mxu0 %v1100_v15  ;;  %v523_v25 = vld [vmem:[#allocation8 + $0x30] sm:$0xff]  ;;  %v522_v26 = vld [vmem:[#allocation8 + $0x28] sm:$0xff]  ;;  %v521_v27 = vld [vmem:[#allocation8 + $0x20] sm:$0xff] }
 0x156   : > { %837 = vmatpush3.msra.mxu0 %v531_v16  ;;  %v520_v29 = vld [vmem:[#allocation8 + $0x18] sm:$0xff]  ;;  %v519_v30 = vld [vmem:[#allocation8 + $0x10] sm:$0xff]  ;;  %v518_v32 = vld [vmem:[#allocation8 + $0x8] sm:$0xff]  ;;  %vm612_vm1 = vcmp.lt.s32.totalorder %v611_v36, 2 }
 0x157   : > { %838 = vmatprep.subr.mxu0 %v1100_v15  ;;  %v517_v33 = vld [vmem:[#allocation8] sm:$0xff]  ;;  %v740_v37 = vld [vmem:[%s1406_s4] ss:$0 sm:$0xff] }
 0x158   : > { %839 = vmatpush3.msra.mxu0 %v530_v17  ;;  %v512_v19 = vld [vmem:[#allocation2] sm:$0xff] }
 0x159   : > { %840 = vmatprep.subr.mxu0 %v1100_v15  ;;  %935 = vtanh.f32 %v512_v19 }
 0x15a   : > { %841 = vmatpush3.msra.mxu0 %v529_v18 }
 0x15b   : > { %842 = vmatprep.subr.mxu0 %v1100_v15 }
 0x15c   : > { %843 = vmatpush3.msra.mxu0 %v528_v20 }
 0x15d   : > { %844 = vmatprep.subr.mxu0 %v1100_v15 }
 0x15e   : > { %845 = vmatpush3.msra.mxu0 %v527_v21 }
 0x15f   : > { %846 = vmatprep.subr.mxu0 %v1100_v15 }
 0x160   : > { %847 = vmatpush3.msra.mxu0 %v526_v22 }
 0x161   : > { %848 = vmatprep.subr.mxu0 %v1100_v15 }
 0x162   : > { %849 = vmatpush3.msra.mxu0 %v525_v23 }
 0x163   : > { %850 = vmatprep.subr.mxu0 %v1100_v15 }
 0x164   : > { %851 = vmatpush3.msra.mxu0 %v524_v24 }
 0x165   : > { %852 = vmatprep.subr.mxu0 %v1100_v15 }
 0x166   : > { %853 = vmatpush3.msra.mxu0 %v523_v25  ;;  %v936_v28 = vpop.eup %935 }
 0x167   : > { %854 = vmatprep.subr.mxu0 %v1100_v15  ;;  %v514_v31 = vadd.f32 1.767767e-07, %v936_v28 }
 0x168   : > { %855 = vmatpush3.msra.mxu0 %v522_v26 }
 0x169   : > { %856 = vmatprep.subr.mxu0 %v1100_v15  ;;  %v739_v34 = vclamps-f32 %v514_v31, 0.01767767 }
 0x16a   : > { %857 = vmatpush3.msra.mxu0 %v521_v27 }
 0x16b   : > { %858 = vmatprep.subr.mxu0 %v1100_v15 }
 0x16c   : > { %859 = vmatpush3.msra.mxu0 %v520_v29 }
 0x16d   : > { %860 = vmatprep.subr.mxu0 %v1100_v15 }
 0x16e   : > { %861 = vmatpush3.msra.mxu0 %v519_v30 }
 0x16f   : > { %862 = vmatprep.subr.mxu0 %v1100_v15 }
 0x170   : > { %863 = vmatpush3.msra.mxu0 %v518_v32 }
 0x171   : > { %864 = vmatprep.subr.mxu0 %v1100_v15 }
 0x172   : > { %865 = vmatpush3.msra.mxu0 %v517_v33 }
 0x173   : > { %867 = vmatmul.mubr.f32.vlgmr.msra.gmra.mxu0 %v739_v34 }
 0x233   : > { %v606_v38 = vpop.f32.mrf.mxu0 }
 0x234   : > { %v607_v39 = vadd.f32 %v740_v37, %v606_v38 }
 0x235   : > { %v868_v40 = vpop.f32.mrf.mxu0 }
 0x236   : > { %v613_v41 = vsel %vm612_vm1, %v607_v39, -inf }
 0x237   : > { %v614_v42 = vrot.slane %v613_v41, 4 }
 0x239   : > { %v615_v43 = vmax.f32 %v613_v41, %v614_v42 }
 0x23b   : > { %v616_v44 = vrot.slane %v615_v43, 2 }
 0x23d   : > { %v617_v45 = vmax.f32 %v615_v43, %v616_v44 }
 0x23f   : > { %v618_v46 = vrot.slane %v617_v45, 1 }
 0x241   : > { %v619_v47 = vmax.f32 %v617_v45, %v618_v46 }
 0x243   : > { %v620_v48 = vsub.f32 %v613_v41, %v619_v47 }
 0x245   : > { %v621_v49 = vmul.f32 1.442695, %v620_v48 }
 0x247   : > { %937 = vpow2.f32 %v621_v49 }
 0x254   : > { %v938_v50 = vpop.eup %937 }
 0x255   : > { %v623_v51 = vrot.slane %v938_v50, 4 }
 0x257   : > { %v624_v52 = vadd.f32 %v938_v50, %v623_v51 }
 0x259   : > { %v625_v53 = vrot.slane %v624_v52, 2 }
 0x25b   : > { %v626_v54 = vadd.f32 %v625_v53, %v624_v52 }
 0x25d   : > { %v627_v55 = vrot.slane %v626_v54, 1 }
 0x25f   : > { %v628_v56 = vadd.f32 %v627_v55, %v626_v54 }
 0x261   : > { %939 = vlog2.f32 %v628_v56 }
 0x26e   : > { %v940_v57 = vpop.eup %939 }
 0x26f   : > { %v630_v58 = vmul.f32 0.6931472, %v940_v57 }
 0x271   : > { %v631_v59 = vsub.f32 %v620_v48, %v630_v58 }
 0x273   : > { %632 = vst [vmem:[#allocation9] sm:$0xff] %v631_v59 }
 0x274 PF: > { %p895_p10 = scmp.eq.s32.totalorder %s1152_s22, 1  ;;  %s1102_s9 = smov [#allocation9]  }
 0x275   : > { %s640_s25 = sshll.u32 %s1102_s9, 4  ;;  %s641_s25 = int_to_ptr.vmem [resolvable:$true] %s640_s25 }
 0x276   : > { %s1023_s27 = scalar_lea.vmem %s641_s25, 128  ;;  %p1030_p2 = scmp.lt.s32.totalorder %s641_s25, %s641_s25 }
 0x277   : > { %p1024_p11 = scmp.ne.s32.totalorder %s641_s25, %s1023_s27  ;;  %p1031_p7 = scmp.lt.s32.totalorder %s1023_s27, %s1023_s27 }
 0x279   : > { %p1025_p12 = pnand %p1024_p11, %p895_p10  ;;  %p1032_p1 = por %p1031_p7, %p1030_p2 }
 0x27b   : > { %p1026_p13 = pneg %p1025_p12 }
 0x27d   : > { %p1033_p4 = pnand %p1032_p1, %p1026_p13 }
 0x27f   : > { %1036 = shalt.err (!%p1033_p4)
}
 0x280   : > { %878 = dma.vmem_to_hbm [thread:$0]  (%p895_p10), %s641_s25, 128, %s1407_s5, [#allocation5]  }
 0x281   : > { %1076 = dma.done.wait (%p895_p10), [#allocation5], 128  }
 0x282   : > { %1078 = vsyncadd (%p895_p10), [#allocation5], 4294967168 }
 0x283 PF: > { %p19_p3 = scmp.ge.s32.totalorder %s1178_s28, 4   ;;  %s1418_s18 = smov %s1085_s19 }
 0x284   : > { %s1419_s19 = smov %s1089_s20  ;;  %s1420_s20 = smov %s1198_s11 }
 0x285   : > { %s1421_s21 = smov %s1178_s28  ;;  %21 = sbr.rel (!%p19_p3) target bundleno = 6 (0x6), region = 102 }
 0x28a   :  { %653 = vsyncpa [#allocation4], 1 }
 0x28b   :  { %655 = vsyncpa [#allocation4 + $0x1], 1 }
 0x28c   :  { %656 = vsyncpa [#allocation7], 1 }
 0x28d   :  { %658 = vsyncpa [#allocation7 + $0x1], 1 }
 0x28e   :  { %659 = vsyncpa [#allocation5], 1 }
 0x28f   :  { %661 = vsyncpa [#allocation5 + $0x1], 1 }

</bundles_post_ra>
